<compile_context>
chip_gen: v5e
topology: v5e:2x2
jax: 0.10.0
libtpu: 0.0.40
codegen_flags: <defaults>
</compile_context>

<pallas_src>
import functools

import jax
import jax.numpy as jnp
from jax import lax
from jax.experimental import pallas as pl
from jax.experimental.pallas import tpu as pltpu


def _inner_product_kernel(x1_ref, x2_ref, out_ref, *, normalize: bool):
    x1 = x1_ref[...]
    x2 = x2_ref[...]

    # Elementwise products in the input dtype, accumulation in f32
    # (matches torch bmm-in-bf16 semantics while keeping a stable sum).
    s12 = jnp.sum(x1 * x2, axis=-1, dtype=jnp.float32)          # (tb,)

    if normalize:
        # torch.nn.functional.normalize(p=2, dim=1, eps=1e-12):
        #   x / max(||x||, eps).  Fused per-row:
        #   out = s12 * rsqrt(max(s1, eps^2)) * rsqrt(max(s2, eps^2))
        eps_sq = jnp.float32(1e-24)
        s1 = jnp.sum(x1 * x1, axis=-1, dtype=jnp.float32)        # (tb,)
        s2 = jnp.sum(x2 * x2, axis=-1, dtype=jnp.float32)        # (tb,)
        s12 = s12 * lax.rsqrt(jnp.maximum(s1, eps_sq)) * lax.rsqrt(jnp.maximum(s2, eps_sq))

    # Lane-dense store: one (1, tb) row per grid step.
    out_ref[...] = s12.reshape(1, -1).astype(out_ref.dtype)


def _vmem_capacity_bytes() -> int:
    try:
        cap = int(getattr(pltpu.get_tpu_info(), "vmem_capacity_bytes"))
        if cap > 0:
            return cap
    except Exception:
        pass
    return 64 * 1024 * 1024  # conservative default: v7x per-TC VMEM


def _batch_dim_semantics():
    # v7x has 2 TensorCores per chip: shard the batch axis across them.
    try:
        kind = jax.devices()[0].device_kind.lower()
    except Exception:
        kind = ""
    if "v7" in kind and hasattr(pltpu, "CORE_PARALLEL"):
        return (pltpu.CORE_PARALLEL,)
    return ("parallel",)


def _pick_tiling(B: int, D: int, itemsize: int):
    """Pick batch-tile rows and an explicit scoped-VMEM limit.

    Per-input tile budget = VMEM/16 (8 MiB on 128 MiB v5e/v6e, 4 MiB on
    64 MiB/TC v7x) so the double-buffered working set (2 inputs x 2 buffers)
    stays at ~1/4 of physical VMEM on every generation.
    """
    vmem_cap = _vmem_capacity_bytes()
    per_input_budget = max(vmem_cap // 16, 512 * 1024)
    row_bytes = max(D * itemsize, 1)
    budget_rows = max(per_input_budget // row_bytes, 1)

    if B < 8:
        tb = B  # single full-batch block (tiny problem)
    else:
        tb = min(budget_rows, B, 8192)
        if tb >= 128:
            tb = (tb // 128) * 128      # lane-dense, unmasked output row stores
        else:
            tb = max((tb // 8) * 8, 8)  # sublane-aligned

    tile_bytes = tb * row_bytes
    vmem_limit = 4 * tile_bytes + (8 << 20)      # 2 inputs x 2 buffers + headroom
    vmem_limit = max(vmem_limit, 16 << 20)
    vmem_limit = min(vmem_limit, vmem_cap * 3 // 4)
    return tb, int(vmem_limit)


def inner_product(x1, x2, *, normalize: bool = False):
    """x1, x2: (B, D) arrays of identical shape. Returns (B,) row-wise inner products."""
    assert x1.shape == x2.shape and x1.ndim == 2
    B, D = x1.shape
    itemsize = jnp.dtype(x1.dtype).itemsize
    tb, vmem_limit = _pick_tiling(B, D, itemsize)
    num_tiles = pl.cdiv(B, tb)

    # TODO(synk): for genuinely small D (e.g. D=32) a lane-folding reshape to
    # (B*D/128, 128) in the wrapper would fill all 128 lanes; skipped since
    # that regime is launch-overhead dominated anyway.

    kernel = functools.partial(_inner_product_kernel, normalize=normalize)

    out2d = pl.pallas_call(
        kernel,
        out_shape=jax.ShapeDtypeStruct((num_tiles, tb), x1.dtype),
        grid=(num_tiles,),
        in_specs=[
            pl.BlockSpec((tb, D), lambda i: (i, 0)),
            pl.BlockSpec((tb, D), lambda i: (i, 0)),
        ],
        out_specs=pl.BlockSpec((1, tb), lambda i: (i, 0)),
        compiler_params=pltpu.CompilerParams(
            dimension_semantics=_batch_dim_semantics(),
            vmem_limit_bytes=vmem_limit,
        ),
    )(x1, x2)

    # Matches the module's .reshape(-1); drop rows added by the padded tail tile.
    return out2d.reshape(-1)[:B]


if __name__ == "__main__":
    key = jax.random.PRNGKey(0)

    def ref_inner(a, b, normalize):
        if normalize:
            a = a / jnp.maximum(jnp.linalg.norm(a, axis=1, keepdims=True), 1e-12)
            b = b / jnp.maximum(jnp.linalg.norm(b, axis=1, keepdims=True), 1e-12)
        return jnp.sum(a * b, axis=1)

    # Module-scale shapes: batch=2, hidden=32 (single full-batch block).
    k1, k2 = jax.random.split(key)
    x1 = jax.random.normal(k1, (2, 32), dtype=jnp.float32)
    x2 = jax.random.normal(k2, (2, 32), dtype=jnp.float32)
    for norm in (False, True):
        out = inner_product(x1, x2, normalize=norm)
        jax.block_until_ready(out)
        assert out.shape == (2,)
        assert jnp.allclose(out, ref_inner(x1, x2, norm), atol=1e-5, rtol=1e-5)

    # Ragged-batch path: tiled grid with a padded boundary block + lane-dense slab.
    k3, k4 = jax.random.split(k2)
    y1 = jax.random.normal(k3, (300, 32), dtype=jnp.float32)
    y2 = jax.random.normal(k4, (300, 32), dtype=jnp.float32)
    for norm in (False, True):
        out = inner_product(y1, y2, normalize=norm)
        jax.block_until_ready(out)
        assert out.shape == (300,)
        assert jnp.allclose(out, ref_inner(y1, y2, norm), atol=1e-5, rtol=1e-5)

    print("KERNEL_OK")
</pallas_src>

<mosaic_0001>
module attributes {stable_mosaic.version = 11 : i64} {
  func.func @_inner_product_kernel(%arg0: i32, %arg1: memref<2x32xf32, #tpu.memory_space<vmem>>, %arg2: memref<2x32xf32, #tpu.memory_space<vmem>>, %arg3: memref<1x2xf32, #tpu.memory_space<vmem>>) attributes {dimension_semantics = [#tpu.dimension_semantics<parallel>], iteration_bounds = array<i64: 1>, scalar_prefetch = 0 : i64, scratch_operands = 0 : i64, tpu.core_type = #tpu.core_type<tc>, window_params = [{transform_indices = @transform_0, window_bounds = array<i64: 2, 32>}, {transform_indices = @transform_1, window_bounds = array<i64: 2, 32>}, {transform_indices = @transform_2, window_bounds = array<i64: 1, 2>}]} {
    %c0 = arith.constant 0 : index
    %c0_0 = arith.constant 0 : index
    %0 = vector.load %arg1[%c0, %c0_0] : memref<2x32xf32, #tpu.memory_space<vmem>>, vector<2x32xf32>
    %c0_1 = arith.constant 0 : index
    %c0_2 = arith.constant 0 : index
    %1 = vector.load %arg2[%c0_1, %c0_2] : memref<2x32xf32, #tpu.memory_space<vmem>>, vector<2x32xf32>
    %2 = arith.mulf %0, %1 : vector<2x32xf32>
    %cst = arith.constant dense<0.000000e+00> : vector<2xf32>
    %3 = vector.multi_reduction <add>, %2, %cst [1] : vector<2x32xf32> to vector<2xf32>
    %4 = vector.shape_cast %3 : vector<2xf32> to vector<1x2xf32>
    %c0_3 = arith.constant 0 : index
    %c0_4 = arith.constant 0 : index
    %5 = vector.load %arg3[%c0_3, %c0_4] : memref<1x2xf32, #tpu.memory_space<vmem>>, vector<1x2xf32>
    tpu.vector_store %arg3[%c0_3, %c0_4], %4 {strides = array<i32>} : memref<1x2xf32, #tpu.memory_space<vmem>>, vector<1x2xf32>,
    return
  }
  func.func @transform_0(%arg0: i32) -> (i32, i32) {
    %c0_i32 = arith.constant 0 : i32
    %c0_i32_0 = arith.constant 0 : i32
    return %arg0, %c0_i32 : i32, i32
  }
  func.func @transform_1(%arg0: i32) -> (i32, i32) {
    %c0_i32 = arith.constant 0 : i32
    %c0_i32_0 = arith.constant 0 : i32
    return %arg0, %c0_i32 : i32, i32
  }
  func.func @transform_2(%arg0: i32) -> (i32, i32) {
    %c0_i32 = arith.constant 0 : i32
    %c0_i32_0 = arith.constant 0 : i32
    return %arg0, %c0_i32 : i32, i32
  }
}

</mosaic_0001>

<bundles_post_ra>
// kernel: tpu_custom_call.1
= control target key start
LH: loop header
LB: loop body
LE: loop exit
PB: predicated region body
PF: predicated region fallthrough
CT: control target
= control target key end

     0   :  { %7 = vsyncpa [#allocation3], 0  ;;  %s180_s0 = inlined_call_operand.hbm [shape: f32[2,32], index: 0, kind: input, shape index: {}]   ;;  %s181_s1 = inlined_call_operand.hbm [shape: f32[2,32], index: 1, kind: input, shape index: {}]   ;;  %s182_s2 = inlined_call_operand.hbm [shape: f32[1,2], index: 2, kind: output, shape index: {}]  }
   0x1   :  { %8 = vsyncpa [#allocation6], 0 }
   0x2   :  { %9 = vsyncpa [#allocation4], 0  ;;  %s15_s11 = sshll.u32 %s180_s0, 4  ;;  %s153_s12 = smov [#allocation2]   ;;  %s16_s11 = int_to_ptr.hbm [resolvable:$true] %s15_s11 }
   0x3   :  { %s17_s13 = sshll.u32 %s153_s12, 4  ;;  %s26_s16 = sshll.u32 %s181_s1, 4  ;;  %s18_s13 = int_to_ptr.vmem [resolvable:$true] %s17_s13  ;;  %s27_s16 = int_to_ptr.hbm [resolvable:$true] %s26_s16 }
   0x4   :  { %20 = dma.hbm_to_vmem [thread:$0]  %s16_s11, 32, %s18_s13, [#allocation3]  }
   0x5   :  { %s154_s17 = smov [#allocation5]  }
   0x6   :  { %s28_s18 = sshll.u32 %s154_s17, 4  ;;  %s29_s18 = int_to_ptr.vmem [resolvable:$true] %s28_s18 }
   0x7   :  { %31 = dma.hbm_to_vmem [thread:$0]  %s27_s16, 32, %s29_s18, [#allocation6]  }
   0x8   :  { %147 = dma.done.wait [#allocation3], 32  }
   0x9   :  { %148 = vsyncadd [#allocation3], 4294967264 }
   0xa   :  { %149 = dma.done.wait [#allocation6], 32  }
   0xb   :  { %150 = vsyncadd [#allocation6], 4294967264  ;;  %v40_v0 = vld [vmem:[#allocation2] sm:$0x3]  ;;  %v41_v1 = vld [vmem:[#allocation5] sm:$0x3]  ;;  %v48_v4 = vlaneseq }
   0xc   :  { %vm43_vm0 = vcmask 254976   ;;  %v42_v2 = vmul.f32 %v41_v1, %v40_v0  ;;  %s155_s0 = smov [#allocation7]   ;;  %s61_s21 = sshll.u32 %s182_s2, 4  ;;  %vm52_vm1 = vcmask 8192   ;;  %s62_s21 = int_to_ptr.hbm [resolvable:$true] %s61_s21 }
   0xd   :  { %v49_v5 = vand.u32 127, %v48_v4  ;;  %s59_s1 = sshll.u32 %s155_s0, 4  ;;  %s60_s1 = int_to_ptr.vmem [resolvable:$true] %s59_s1 }
   0xe   :  { %v44_v3 = vsel %vm43_vm0, %v42_v2, 0.0 }
   0xf   :  { %45 = vadd.xlane.f32.xlu0 %v44_v3 }
  0x82   :  { %v46_v6 = vpop.xlane.xlu0 %45 }
  0x83   :  { %v50_v7 = vperm.slane %v46_v6, %v49_v5 }
  0x85   :  { %53 = vst.msk [vmem:[#allocation7] sm:$0x1] %vm52_vm1, %v50_v7 }
  0x86   :  { %64 = dma.vmem_to_hbm [thread:$0]  %s60_s1, 16, %s62_s21, [#allocation4]  }
  0x87   :  { %151 = dma.done.wait [#allocation4], 16  }
  0x88   :  { %152 = vsyncadd [#allocation4], 4294967280 }
  0x89   :  { %69 = vsyncpa [#allocation3], 1 }
  0x8a   :  { %70 = vsyncpa [#allocation6], 1 }
  0x8b   :  { %71 = vsyncpa [#allocation4], 1 }

</bundles_post_ra>
